<compile_context>
chip_gen: v7x
topology: tpu7x:2x2x1
jax: 0.10.0
libtpu: 0.0.40
codegen_flags: <defaults>
</compile_context>

<pallas_src>
import jax
import jax.numpy as jnp
from jax.experimental import pallas as pl
from jax.experimental.pallas import tpu as pltpu

LANE = 128
SUBLANE = 8
MAX_LANE_BLOCK = 2048


def _round_up(x, m):
    return ((x + m - 1) // m) * m


# ---------------------------------------------------------------------------
# Fused kernel: synthetic inner model over the two distinct CFG branches + the
# collapsed CFG guidance combination.
#   scalars : (2,)  SMEM f32  [a, b]  (CFG scales folded with 1/sqrt(sigma^2+1))
#   zf      : (C, HWB)  bf16  latent (spatial flattened into lanes)
#   cc_c    : (C, HWB)  bf16  cond   c_concat
#   cc_u    : (C, HWB)  bf16  uncond c_concat
#   w1z     : (CP, C)   bf16  1x1-conv weight, z half   (rows C..CP zero)
#   w1c     : (CP, C)   bf16  1x1-conv weight, cc half  (rows C..CP zero)
#   bias    : (CP, 1)   f32   precombined pooled cross-attn bias column
#   out     : (CP, HWB) f32   CFG-combined result (rows C..CP are zero padding)
# ---------------------------------------------------------------------------
def cfg_denoise_kernel(scalars_ref, z_ref, cc_c_ref, cc_u_ref,
                       w1z_ref, w1c_ref, bias_ref, out_ref):
    a = scalars_ref[0]   # image_cfg_scale / sqrt(sigma^2 + 1)
    b = scalars_ref[1]   # (1 - image_cfg_scale) / sqrt(sigma^2 + 1)

    # Shared-z term computed once; one extra dot per distinct c_concat branch.
    yz = jnp.dot(w1z_ref[...], z_ref[...], preferred_element_type=jnp.float32)
    y_cond = yz + jnp.dot(w1c_ref[...], cc_c_ref[...],
                          preferred_element_type=jnp.float32)
    y_unc = yz + jnp.dot(w1c_ref[...], cc_u_ref[...],
                         preferred_element_type=jnp.float32)

    # Collapsed CFG combine:
    #   out = c_scale*(im*y_cond + (1-im)*y_unc) + c_scale*(t*b_c + (1-t)*b_u)
    # with the bias term precombined into a single broadcast column.
    out_ref[...] = (a * y_cond + b * y_unc + bias_ref[...]).astype(out_ref.dtype)


# ---------------------------------------------------------------------------
# One-time parameter prep: split w1 into its z / c_concat halves, pad the
# output-channel axis to a full sublane group, and cast to bf16.
# ---------------------------------------------------------------------------
def prepare_params(w1, w2):
    C = w1.shape[0]
    CP = _round_up(C, SUBLANE)
    w1z = jnp.zeros((CP, C), jnp.bfloat16).at[:C].set(
        w1[:, :C].astype(jnp.bfloat16))
    w1c = jnp.zeros((CP, C), jnp.bfloat16).at[:C].set(
        w1[:, C:].astype(jnp.bfloat16))
    return {"w1z": w1z, "w1c": w1c, "w2": w2.astype(jnp.float32),
            "C": C, "CP": CP}


# ---------------------------------------------------------------------------
# Wrapper: reproduces CFGDenoiser.forward semantics.
# TODO(synk): real inner_model is a full diffusion UNet; replaced here by a
# synthetic linear denoiser with the same call signature / CFG structure.
# ---------------------------------------------------------------------------
def cfg_denoiser_forward(z, sigma, cond, uncond,
                         text_cfg_scale, image_cfg_scale, params):
    w1z, w1c, w2 = params["w1z"], params["w1c"], params["w2"]
    C, CP = params["C"], params["CP"]
    _, _, H, W = z.shape
    HW = H * W
    HW_P = _round_up(HW, LANE)                   # lane-aligned spatial extent
    lane_block = min(HW_P, MAX_LANE_BLOCK)       # multiple of 128 by construction
    n_blocks = HW_P // lane_block

    def flat(x):                                 # (C,H,W) -> bf16 (C, HW_P)
        x = x.reshape(C, HW).astype(jnp.bfloat16)
        if HW_P != HW:
            x = jnp.pad(x, ((0, 0), (0, HW_P - HW)))
        return x

    zf = flat(z[0])
    cc_c = flat(cond["c_concat"][0][0])
    cc_u = flat(uncond["c_concat"][0][0])

    # Scalar coefficients with 1/sqrt(sigma^2+1) folded in (hoisted rsqrt).
    sig = sigma.reshape(-1)[0].astype(jnp.float32)
    c_scale = jax.lax.rsqrt(sig * sig + 1.0)
    t = jnp.asarray(text_cfg_scale, jnp.float32)
    im = jnp.asarray(image_cfg_scale, jnp.float32)
    a = c_scale * im
    b = c_scale * (1.0 - im)
    scalars = jnp.stack([a, b])

    # Pooled cross-attention bias (3*C scalars), precombined across CFG
    # branches into one column: c_scale * (t*b_cond + (1-t)*b_uncond).
    ctx_c = jnp.mean(cond["c_crossattn"][0][0], axis=0)       # (D,)
    ctx_u = jnp.mean(uncond["c_crossattn"][0][0], axis=0)     # (D,)
    b_c = w2 @ ctx_c                                          # (C,)
    b_u = w2 @ ctx_u                                          # (C,)
    bias_comb = c_scale * (t * b_c + (1.0 - t) * b_u)         # (C,)
    bias_col = jnp.pad(bias_comb, (0, CP - C)).reshape(CP, 1)

    flops = 3 * 2 * CP * C * HW_P + 6 * CP * HW_P
    bytes_accessed = (3 * C * HW_P * 2        # bf16 activations
                      + 2 * CP * C * 2        # bf16 weights
                      + CP * 4 + 2 * 4        # bias column + scalars
                      + CP * HW_P * 4)        # f32 output

    out = pl.pallas_call(
        cfg_denoise_kernel,
        out_shape=jax.ShapeDtypeStruct((CP, HW_P), jnp.float32),
        grid=(n_blocks,),
        in_specs=[
            pl.BlockSpec(memory_space=pltpu.MemorySpace.SMEM),     # scalars
            pl.BlockSpec((C, lane_block), lambda j: (0, j)),       # zf
            pl.BlockSpec((C, lane_block), lambda j: (0, j)),       # cc_c
            pl.BlockSpec((C, lane_block), lambda j: (0, j)),       # cc_u
            pl.BlockSpec((CP, C), lambda j: (0, 0)),               # w1z
            pl.BlockSpec((CP, C), lambda j: (0, 0)),               # w1c
            pl.BlockSpec((CP, 1), lambda j: (0, 0)),               # bias
        ],
        out_specs=pl.BlockSpec((CP, lane_block), lambda j: (0, j)),
        compiler_params=pltpu.CompilerParams(
            dimension_semantics=("parallel",)),
        cost_estimate=pl.CostEstimate(flops=flops, transcendentals=0,
                                      bytes_accessed=bytes_accessed),
    )(scalars, zf, cc_c, cc_u, w1z, w1c, bias_col)

    return out[:C, :HW].reshape(1, C, H, W)


# ---------------------------------------------------------------------------
# Pure-JAX reference for verification (faithful 3-branch formulation of the
# torch module; the synthetic inner model uses bf16 matmul operands with f32
# accumulation, matching the kernel).
# ---------------------------------------------------------------------------
def _reference(z, sigma, cond, uncond, t_scale, i_scale, w1, w2):
    cfg_z = jnp.concatenate([z, z, z], axis=0)
    cfg_sigma = jnp.concatenate([sigma, sigma, sigma], axis=0)
    ca = jnp.concatenate([cond["c_crossattn"][0], uncond["c_crossattn"][0],
                          uncond["c_crossattn"][0]], axis=0)
    cc = jnp.concatenate([cond["c_concat"][0], cond["c_concat"][0],
                          uncond["c_concat"][0]], axis=0)
    N, C, H, W = cfg_z.shape
    hf = jnp.concatenate([cfg_z, cc], axis=1).reshape(N, 2 * C, H * W)
    y = jnp.einsum("ck,nkp->ncp", w1.astype(jnp.bfloat16),
                   hf.astype(jnp.bfloat16),
                   preferred_element_type=jnp.float32)
    ctx = jnp.mean(ca, axis=1)                                   # (N, D)
    bias = jnp.einsum("cd,nd->nc", w2, ctx)                      # (N, C)
    c_scale = 1.0 / jnp.sqrt(cfg_sigma ** 2 + 1.0)
    out = c_scale[:, None, None] * (y + bias[:, :, None])        # (N, C, HW)
    oc, oic, ou = out[0], out[1], out[2]
    res = ou + t_scale * (oc - oic) + i_scale * (oic - ou)
    return res.reshape(1, C, H, W)


if __name__ == "__main__":
    C, H, W = 4, 16, 16          # latent channels / spatial
    T, D = 8, 32                 # text seq len / text hidden

    key = jax.random.PRNGKey(0)
    k = jax.random.split(key, 8)
    z = jax.random.normal(k[0], (1, C, H, W), jnp.float32)
    sigma = jax.random.uniform(k[1], (1,), jnp.float32, 0.5, 2.0)
    cond = {
        "c_crossattn": [jax.random.normal(k[2], (1, T, D), jnp.float32)],
        "c_concat": [jax.random.normal(k[3], (1, C, H, W), jnp.float32)],
    }
    uncond = {
        "c_crossattn": [jax.random.normal(k[4], (1, T, D), jnp.float32)],
        "c_concat": [jax.random.normal(k[5], (1, C, H, W), jnp.float32)],
    }

    # Deterministic synthetic inner-model parameters (prepped once at init).
    wkey = jax.random.PRNGKey(42)
    wk1, wk2 = jax.random.split(wkey)
    w1 = jax.random.normal(wk1, (C, 2 * C), jnp.float32) * 0.1
    w2 = jax.random.normal(wk2, (C, D), jnp.float32) * 0.1
    params = prepare_params(w1, w2)

    text_cfg_scale = 7.5
    image_cfg_scale = 1.5

    out = cfg_denoiser_forward(z, sigma, cond, uncond,
                               text_cfg_scale, image_cfg_scale, params)
    out = jax.block_until_ready(out)

    ref = _reference(z, sigma, cond, uncond,
                     text_cfg_scale, image_cfg_scale, w1, w2)
    assert out.shape == (1, C, H, W)
    assert jnp.allclose(out, ref, atol=1e-4, rtol=1e-4)

    print("KERNEL_OK")
</pallas_src>

<mosaic_0001>
module attributes {stable_mosaic.version = 11 : i64} {
  func.func @cfg_denoise_kernel(%arg0: i32, %arg1: memref<2xf32, #tpu.memory_space<smem>>, %arg2: memref<4x256xbf16, #tpu.memory_space<vmem>>, %arg3: memref<4x256xbf16, #tpu.memory_space<vmem>>, %arg4: memref<4x256xbf16, #tpu.memory_space<vmem>>, %arg5: memref<8x4xbf16, #tpu.memory_space<vmem>>, %arg6: memref<8x4xbf16, #tpu.memory_space<vmem>>, %arg7: memref<8x1xf32, #tpu.memory_space<vmem>>, %arg8: memref<8x256xf32, #tpu.memory_space<vmem>>) attributes {dimension_semantics = [#tpu.dimension_semantics<parallel>], iteration_bounds = array<i64: 1>, scalar_prefetch = 0 : i64, scratch_operands = 0 : i64, tpu.core_type = #tpu.core_type<tc>, window_params = [{transform_indices = @transform_0, window_bounds = array<i64: 2>}, {transform_indices = @transform_1, window_bounds = array<i64: 4, 256>}, {transform_indices = @transform_2, window_bounds = array<i64: 4, 256>}, {transform_indices = @transform_3, window_bounds = array<i64: 4, 256>}, {pipeline_mode = #tpu.pipeline_mode<synchronous>, transform_indices = @transform_4, window_bounds = array<i64: 8, 4>}, {pipeline_mode = #tpu.pipeline_mode<synchronous>, transform_indices = @transform_5, window_bounds = array<i64: 8, 4>}, {pipeline_mode = #tpu.pipeline_mode<synchronous>, transform_indices = @transform_6, window_bounds = array<i64: 8, 1>}, {transform_indices = @transform_7, window_bounds = array<i64: 8, 256>}]} {
    %c0 = arith.constant 0 : index
    %0 = memref.load %arg1[%c0] : memref<2xf32, #tpu.memory_space<smem>>
    %c1 = arith.constant 1 : index
    %1 = memref.load %arg1[%c1] : memref<2xf32, #tpu.memory_space<smem>>
    %c0_0 = arith.constant 0 : index
    %c0_1 = arith.constant 0 : index
    %2 = vector.load %arg5[%c0_0, %c0_1] : memref<8x4xbf16, #tpu.memory_space<vmem>>, vector<8x4xbf16>
    %c0_2 = arith.constant 0 : index
    %c0_3 = arith.constant 0 : index
    %3 = vector.load %arg2[%c0_2, %c0_3] : memref<4x256xbf16, #tpu.memory_space<vmem>>, vector<4x256xbf16>
    %cst = arith.constant dense<0.000000e+00> : vector<8x256xf32>
    %4 = tpu.matmul %2, %3, %cst {dimension_numbers = #tpu.dot_dimension_numbers<[1], [0], [0], [1], [0, 0, 1, 1], [], []>} : vector<8x4xbf16>, vector<4x256xbf16>, vector<8x256xf32> -> vector<8x256xf32>
    %c0_4 = arith.constant 0 : index
    %c0_5 = arith.constant 0 : index
    %5 = vector.load %arg6[%c0_4, %c0_5] : memref<8x4xbf16, #tpu.memory_space<vmem>>, vector<8x4xbf16>
    %c0_6 = arith.constant 0 : index
    %c0_7 = arith.constant 0 : index
    %6 = vector.load %arg3[%c0_6, %c0_7] : memref<4x256xbf16, #tpu.memory_space<vmem>>, vector<4x256xbf16>
    %cst_8 = arith.constant dense<0.000000e+00> : vector<8x256xf32>
    %7 = tpu.matmul %5, %6, %cst_8 {dimension_numbers = #tpu.dot_dimension_numbers<[1], [0], [0], [1], [0, 0, 1, 1], [], []>} : vector<8x4xbf16>, vector<4x256xbf16>, vector<8x256xf32> -> vector<8x256xf32>
    %8 = arith.addf %4, %7 : vector<8x256xf32>
    %c0_9 = arith.constant 0 : index
    %c0_10 = arith.constant 0 : index
    %9 = vector.load %arg6[%c0_9, %c0_10] : memref<8x4xbf16, #tpu.memory_space<vmem>>, vector<8x4xbf16>
    %c0_11 = arith.constant 0 : index
    %c0_12 = arith.constant 0 : index
    %10 = vector.load %arg4[%c0_11, %c0_12] : memref<4x256xbf16, #tpu.memory_space<vmem>>, vector<4x256xbf16>
    %cst_13 = arith.constant dense<0.000000e+00> : vector<8x256xf32>
    %11 = tpu.matmul %9, %10, %cst_13 {dimension_numbers = #tpu.dot_dimension_numbers<[1], [0], [0], [1], [0, 0, 1, 1], [], []>} : vector<8x4xbf16>, vector<4x256xbf16>, vector<8x256xf32> -> vector<8x256xf32>
    %12 = arith.addf %4, %11 : vector<8x256xf32>
    %13 = vector.broadcast %0 : f32 to vector<8x256xf32>
    %14 = arith.mulf %13, %8 : vector<8x256xf32>
    %15 = vector.broadcast %1 : f32 to vector<8x256xf32>
    %16 = arith.mulf %15, %12 : vector<8x256xf32>
    %17 = arith.addf %14, %16 : vector<8x256xf32>
    %c0_14 = arith.constant 0 : index
    %c0_15 = arith.constant 0 : index
    %18 = vector.load %arg7[%c0_14, %c0_15] : memref<8x1xf32, #tpu.memory_space<vmem>>, vector<8x1xf32>
    %19 = vector.broadcast %18 : vector<8x1xf32> to vector<8x256xf32>
    %20 = arith.addf %17, %19 : vector<8x256xf32>
    %c0_16 = arith.constant 0 : index
    %c0_17 = arith.constant 0 : index
    %21 = vector.load %arg8[%c0_16, %c0_17] : memref<8x256xf32, #tpu.memory_space<vmem>>, vector<8x256xf32>
    tpu.vector_store %arg8[%c0_16, %c0_17], %20 {strides = array<i32>} : memref<8x256xf32, #tpu.memory_space<vmem>>, vector<8x256xf32>,
    return
  }
  func.func @transform_0(%arg0: i32) -> i32 {
    %c0_i32 = arith.constant 0 : i32
    %c0_i32_0 = arith.constant 0 : i32
    return %c0_i32 : i32
  }
  func.func @transform_1(%arg0: i32) -> (i32, i32) {
    %c0_i32 = arith.constant 0 : i32
    %c0_i32_0 = arith.constant 0 : i32
    return %c0_i32, %arg0 : i32, i32
  }
  func.func @transform_2(%arg0: i32) -> (i32, i32) {
    %c0_i32 = arith.constant 0 : i32
    %c0_i32_0 = arith.constant 0 : i32
    return %c0_i32, %arg0 : i32, i32
  }
  func.func @transform_3(%arg0: i32) -> (i32, i32) {
    %c0_i32 = arith.constant 0 : i32
    %c0_i32_0 = arith.constant 0 : i32
    return %c0_i32, %arg0 : i32, i32
  }
  func.func @transform_4(%arg0: i32) -> (i32, i32) {
    %c0_i32 = arith.constant 0 : i32
    %c0_i32_0 = arith.constant 0 : i32
    %c0_i32_1 = arith.constant 0 : i32
    return %c0_i32, %c0_i32_0 : i32, i32
  }
  func.func @transform_5(%arg0: i32) -> (i32, i32) {
    %c0_i32 = arith.constant 0 : i32
    %c0_i32_0 = arith.constant 0 : i32
    %c0_i32_1 = arith.constant 0 : i32
    return %c0_i32, %c0_i32_0 : i32, i32
  }
  func.func @transform_6(%arg0: i32) -> (i32, i32) {
    %c0_i32 = arith.constant 0 : i32
    %c0_i32_0 = arith.constant 0 : i32
    %c0_i32_1 = arith.constant 0 : i32
    return %c0_i32, %c0_i32_0 : i32, i32
  }
  func.func @transform_7(%arg0: i32) -> (i32, i32) {
    %c0_i32 = arith.constant 0 : i32
    %c0_i32_0 = arith.constant 0 : i32
    return %c0_i32, %arg0 : i32, i32
  }
}

</mosaic_0001>

<bundles_post_ra>
// kernel: tpu_custom_call.1
= control target key start
LH: loop header
LB: loop body
LE: loop exit
PB: predicated region body
PF: predicated region fallthrough
CT: control target
= control target key end

     0   :  { %12 = vsyncpa [#allocation4], 0  ;;  %s395_s0 = inlined_call_operand.vmem [shape: f32[2], index: 0, kind: input, shape index: {}]   ;;  %s396_s1 = inlined_call_operand.vmem [shape: bf16[4,256], index: 1, kind: input, shape index: {}]   ;;  %s397_s2 = inlined_call_operand.vmem [shape: bf16[4,256], index: 2, kind: input, shape index: {}]   ;;  %s398_s3 = inlined_call_operand.vmem [shape: bf16[4,256], index: 3, kind: input, shape index: {}]   ;;  %s399_s4 = inlined_call_operand.vmem [shape: bf16[8,4], index: 4, kind: input, shape index: {}]   ;;  %s400_s5 = inlined_call_operand.vmem [shape: bf16[8,4], index: 5, kind: input, shape index: {}]   ;;  %s401_s6 = inlined_call_operand.vmem [shape: f32[8,1], index: 6, kind: input, shape index: {}]   ;;  %s402_s7 = inlined_call_operand.hbm [shape: f32[8,256], index: 7, kind: output, shape index: {}]  }
   0x1   :  { %13 = vsyncpa [#allocation3], 0  ;;  %s20_s26 = sshll.u32 %s395_s0, 4  ;;  %s21_s26 = int_to_ptr.vmem [resolvable:$true] %s20_s26 }
   0x2   :  { %s275_s27 = scalar_lea.vmem %s21_s26, 16  ;;  %p280_p1 = scmp.lt.s32.totalorder %s21_s26, %s21_s26 }
   0x3   :  { %p276_p0 = scmp.ne.s32.totalorder %s21_s26, %s275_s27  ;;  %p281_p2 = scmp.lt.s32.totalorder %s275_s27, %s275_s27 }
   0x5   :  { %p282_p3 = por %p281_p2, %p280_p1 }
   0x7   :  { %p283_p4 = pnand %p282_p3, %p276_p0 }
   0x9   :  { %286 = shalt.err (!%p283_p4)
}
   0xa   :  { %s313_s28 = smov [#allocation2]  }
   0xb   :  { %23 = dma.vmem_to_smem %s21_s26, 16, %s313_s28, [#allocation4]  }
   0xc   :  { %309 = dma.done.wait [#allocation4], 16  }
   0xd   :  { %310 = vsyncadd [#allocation4], 4294967280 }
   0xe   :  { %39 = sfence }
   0xf   :  { %v262_v0 = vld.sshfl [vmem:[%s396_s1] sm:$0x33 pattern:$0x76325410]  ;;  %vm58_vm0 = vcmask 1041408   ;;  %v314_v4 = vmov 0  }
  0x10   :  { %v53_v1 = vcombine.high %v262_v0, %v262_v0  ;;  %v265_v2 = vld.sshfl [vmem:[%s397_s2] sm:$0x33 pattern:$0x76325410]  ;;  %v60_v3 = vsel %vm58_vm0, %v262_v0, 0  ;;  %97 = vmatprep.mubr.bf16.mxu0 %v314_v4  ;;  %158 = vmatprep.mubr.bf16.mxu1 %v314_v4  ;;  %vm54_vm1 = vcmask 31744  }
  0x11   :  { %v116_v5 = vcombine.high %v265_v2, %v265_v2  ;;  %v121_v6 = vsel %vm58_vm0, %v265_v2, 0  ;;  %274 = vset.pattern.permute.xlu0 %v314_v4  ;;  %v236_v7 = vld [vmem:[%s401_s6] sm:$0xff]  ;;  %s261_s6 = sld [smem:[#allocation2 + $0x1]] }
  0x12   :  { %263 = vmatprep.subr.msk.bf16.mxu0 %vm58_vm0, %v53_v1  ;;  %v268_v8 = vld.sshfl [vmem:[%s398_s3] sm:$0x33 pattern:$0x76325410]  ;;  %239 = vperm.xlu0 %274, %v236_v7   ;;  %s41_s3 = sld [smem:[#allocation2]] }
  0x13   :  { %266 = vmatprep.subr.msk.bf16.mxu1 %vm58_vm0, %v116_v5  ;;  %66 = vmatpush1.bf16.msra.mxu0 %v60_v3  ;;  %v43_v9 = vld [vmem:[%s399_s4] sm:$0xf]  ;;  %v178_v10 = vcombine.high %v268_v8, %v268_v8  ;;  %v180_v12 = vsel %vm58_vm0, %v268_v8, 0  ;;  %s315_s4 = smov [#allocation5]  }
  0x14   :  { %127 = vmatpush1.bf16.msra.mxu1 %v121_v6  ;;  %v106_v11 = vld [vmem:[%s400_s5] sm:$0xf]  ;;  %s252_s5 = sshll.u32 %s315_s4, 4  ;;  %s253_s5 = int_to_ptr.vmem [resolvable:$true] %s252_s5 }
  0x15   :  { %269 = vmatprep.subr.msk.bf16.mxu0 %vm58_vm0, %v178_v10  ;;  %s287_s15 = scalar_lea.vmem %s253_s5, 256  ;;  %p292_p6 = scmp.lt.s32.totalorder %s253_s5, %s253_s5 }
  0x16   :  { %264 = vmatmul.mubr.msk.bf16.vlgmr.msra.gmra.mrb[0].mxu0 %vm54_vm1, %v43_v9  ;;  %p288_p5 = scmp.ne.s32.totalorder %s253_s5, %s287_s15  ;;  %p293_p7 = scmp.lt.s32.totalorder %s287_s15, %s287_s15 }
  0x17   :  { %267 = vmatmul.mubr.msk.bf16.vlgmr.msra.gmra.mrb[0].mxu1 %vm54_vm1, %v106_v11  ;;  %186 = vmatpush1.bf16.msra.mxu0 %v180_v12  ;;  %v231_v25 = vstv %s261_s6 }
  0x18   :  { %217 = vmatprep.mubr.bf16.mxu0 %v314_v4  ;;  %v228_v23 = vstv %s41_s3  ;;  %p294_p8 = por %p293_p7, %p292_p6 }
  0x1a   :  { %p295_p9 = pnand %p294_p8, %p288_p5 }
  0x1e   :  { %270 = vmatmul.mubr.msk.bf16.vlgmr.msra.gmra.mrb[4].mxu0 %vm54_vm1, %v106_v11 }
  0x91   :  { %v240_v35 = vpop.permute.xlu0 %239 }
  0xe9   :  { %v99_v13 = vpop.f32.mrb[0].mxu0 }
  0xea   :  { %v160_v14 = vpop.f32.mrb[0].mxu1  ;;  %v101_v15 = vpop.f32.mrb[1].mxu0 }
  0xeb   :  { %v167_v16 = vadd.f32 %v160_v14, %v99_v13  ;;  %v162_v17 = vpop.f32.mrb[1].mxu1  ;;  %v103_v18 = vpop.f32.mrb[2].mxu0 }
  0xec   :  { %v168_v19 = vadd.f32 %v162_v17, %v101_v15  ;;  %v104_v20 = vpop.f32.mrb[3].mxu0  ;;  %v164_v21 = vpop.f32.mrb[2].mxu1 }
  0xed   :  { %v165_v22 = vpop.f32.mrb[3].mxu1  ;;  %v229_v30 = vmul.f32 %v228_v23, %v167_v16 }
  0xee   :  { %v230_v33 = vmul.f32 %v228_v23, %v168_v19 }
  0xf1   :  { %v219_v24 = vpop.f32.mrb[4].mxu0 }
  0xf2   :  { %v226_v26 = vadd.f32 %v219_v24, %v99_v13  ;;  %v221_v27 = vpop.f32.mrb[5].mxu0 }
  0xf3   :  { %v227_v28 = vadd.f32 %v221_v27, %v101_v15  ;;  %v223_v29 = vpop.f32.mrb[6].mxu0 }
  0xf4   :  { %v232_v31 = vmul.f32 %v231_v25, %v226_v26  ;;  %v224_v32 = vpop.f32.mrb[7].mxu0 }
  0xf5   :  { %v233_v34 = vmul.f32 %v231_v25, %v227_v28 }
  0xf6   :  { %v234_v36 = vadd.f32 %v232_v31, %v229_v30 }
  0xf7   :  { %v235_v37 = vadd.f32 %v233_v34, %v230_v33 }
  0xf8   :  { %v242_v38 = vadd.f32 %v240_v35, %v234_v36 }
  0xf9   :  { %v243_v39 = vadd.f32 %v240_v35, %v235_v37 }
  0xfa   :  { %244 = vst [vmem:[#allocation5] sm:$0xff] %v242_v38 }
  0xfb   :  { %245 = vst [vmem:[#allocation5 + $0x8] sm:$0xff] %v243_v39 }
  0xfc   :  { %298 = shalt.err (!%p295_p9)
}
  0xfd   :  { %s299_s18 = scalar_lea.hbm %s402_s7, 256 }
  0xfe   :  { %p300_p10 = scmp.ne.s32.totalorder %s402_s7, %s299_s18  ;;  %p303_p11 = scmp.lt.u32.totalorder %s299_s18, %s402_s7 }
 0x100   :  { %p305_p12 = pnand %p303_p11, %p300_p10 }
 0x102   :  { %308 = shalt.err (!%p305_p12)
}
 0x103   :  { %255 = dma.vmem_to_hbm [thread:$0]  %s253_s5, 256, %s402_s7, [#allocation3]  }
 0x104   :  { %311 = dma.done.wait [#allocation3], 256  }
 0x105   :  { %312 = vsyncadd [#allocation3], 4294967040 }
 0x106   :  { %259 = vsyncpa [#allocation3], 1 }
 0x107   :  { %260 = vsyncpa [#allocation4], 1 }

</bundles_post_ra>
